<compile_context>
chip_gen: v7x
topology: tpu7x:2x2x1
jax: 0.10.0
libtpu: 0.0.40
codegen_flags: <defaults>
</compile_context>

<pallas_src>
import functools

import jax
import jax.numpy as jnp
from jax.experimental import pallas as pl
from jax.experimental.pallas import tpu as pltpu


def _centernorm_kernel(x_ref, gamma_ref, beta_ref, o_ref, *, scale, cdtype):
    """Unpacked path: one row per tile row, mean over the lane axis."""
    x = x_ref[...]
    # Accumulate the mean in f32 regardless of compute dtype.
    mean = jnp.mean(x.astype(jnp.float32), axis=-1, keepdims=True).astype(cdtype)
    # Fuse D/(D-1) into gamma: a (1, D) mul instead of a full-tile mul.
    g = (gamma_ref[...].astype(jnp.float32) * scale).astype(cdtype)
    b = beta_ref[...].astype(cdtype)
    y = (x.astype(cdtype) - mean) * g + b
    o_ref[...] = y.astype(o_ref.dtype)


def _centernorm_packed_kernel(x_ref, avg_ref, gamma_ref, beta_ref, o_ref, *,
                              scale, cdtype):
    """Lane-packed path: k rows folded into the lane axis (width k*D).

    Per-segment means are produced lane-dense via a block-diagonal averaging
    matmul: (x @ A)[r, j*D + c] = mean of original row (r*k + j).
    """
    x = x_ref[...]
    mean_b = jnp.dot(x.astype(jnp.float32), avg_ref[...],
                     preferred_element_type=jnp.float32).astype(cdtype)
    g = (gamma_ref[...].astype(jnp.float32) * scale).astype(cdtype)
    b = beta_ref[...].astype(cdtype)
    y = (x.astype(cdtype) - mean_b) * g + b
    o_ref[...] = y.astype(o_ref.dtype)


def _round_up(v, m):
    return ((v + m - 1) // m) * m


def _vmem_capacity_bytes():
    """Per-TensorCore VMEM capacity; conservative fallback if query fails."""
    try:
        return int(pltpu.get_tpu_info().vmem_capacity_bytes)
    except Exception:  # non-TPU backend / API drift -> assume smallest (v7x)
        return 64 * 1024 * 1024


def center_norm(x, gamma, beta, *, block_rows=None, vmem_limit_bytes=None):
    """CenterNorm forward.

    x:     [..., D_last]
    gamma: [D_last]   (module init: ones)
    beta:  [D_last]   (module init: zeros)
    """
    orig_shape = x.shape
    d_last = int(orig_shape[-1])
    assert gamma.size == d_last, (
        "only 1-D normalized_shape supported: gamma.size must equal x.shape[-1]")
    D = int(gamma.size)
    if D <= 1:
        raise ValueError("CenterNorm requires D > 1 (scale D/(D-1)).")
    scale = float(D) / float(D - 1)

    itemsize = jnp.dtype(x.dtype).itemsize
    # Keep elementwise math in bf16 for bf16 inputs (mean still accumulated in
    # f32); everything else computes in f32.
    cdtype = jnp.bfloat16 if x.dtype == jnp.bfloat16 else jnp.float32
    csz = jnp.dtype(cdtype).itemsize
    # Sublane packing: f32 -> 8 rows/vreg, bf16 -> 16, int8/fp8 -> 32.
    sublane = max(8, 32 // max(itemsize, 1))

    # ---- generation-aware VMEM budget / limit -------------------------------
    vmem_cap = _vmem_capacity_bytes()
    if vmem_cap >= 128 * 1024 * 1024:        # v5e / v6e: 128 MiB per TC
        budget_bytes = 56 * 1024 * 1024
        default_limit = 100 * 1024 * 1024
    else:                                    # v7x: 64 MiB per TC
        budget_bytes = 24 * 1024 * 1024
        default_limit = 48 * 1024 * 1024
    if vmem_limit_bytes is None:
        vmem_limit_bytes = default_limit

    # ---- rows axis + optional lane packing for small D ----------------------
    rows = 1
    for s in orig_shape[:-1]:
        rows *= int(s)

    k = 1
    if d_last < 128 and 128 % d_last == 0 and rows % (128 // d_last) == 0:
        k = 128 // d_last                    # fold k rows into the lane axis
    d_lane = k * d_last                      # lane width presented to the kernel
    prows = rows // k                        # packed row count

    x2 = x.reshape(prows, d_lane)            # no padding; ragged block is masked
    g2 = (jnp.tile(gamma.reshape(-1), (k,)) if k > 1 else gamma).reshape(1, d_lane)
    b2 = (jnp.tile(beta.reshape(-1), (k,)) if k > 1 else beta).reshape(1, d_lane)

    # ---- tile sizing: bytes, not rows ---------------------------------------
    # Per packed row, VMEM holds: 2x input double-buffer + 2x output
    # double-buffer (input dtype) + ~3 compute-dtype temps.
    per_row_bytes = d_lane * (4 * itemsize + 3 * csz)
    if block_rows is None:
        block_rows = max(budget_bytes // max(per_row_bytes, 1), 1)
    block_rows = max(sublane, (int(block_rows) // sublane) * sublane)
    block_rows = min(block_rows, _round_up(prows, sublane))

    grid = (pl.cdiv(prows, block_rows),)

    cost = pl.CostEstimate(
        flops=3 * rows * d_last + (2 * prows * d_lane * d_lane if k > 1 else 0),
        transcendentals=0,
        bytes_accessed=2 * rows * d_last * itemsize + 2 * d_lane * 4,
    )

    compiler_params = pltpu.CompilerParams(
        # rows axis is fully independent -> shardable across the 2 TCs on v7x.
        dimension_semantics=("parallel",),
        vmem_limit_bytes=int(vmem_limit_bytes),
    )

    x_spec = pl.BlockSpec((block_rows, d_lane), lambda i: (i, 0))
    gb_spec = pl.BlockSpec((1, d_lane), lambda i: (0, 0))
    out_spec = pl.BlockSpec((block_rows, d_lane), lambda i: (i, 0))

    if k > 1:
        # Block-diagonal averaging matrix: A[i, m] = 1/D iff i, m are in the
        # same D-wide lane segment. x @ A broadcasts each segment's mean.
        avg = jnp.kron(jnp.eye(k, dtype=jnp.float32),
                       jnp.full((d_last, d_last), 1.0 / d_last, jnp.float32))
        out = pl.pallas_call(
            functools.partial(_centernorm_packed_kernel, scale=scale,
                              cdtype=cdtype),
            out_shape=jax.ShapeDtypeStruct((prows, d_lane), x.dtype),
            grid_spec=pltpu.PrefetchScalarGridSpec(
                num_scalar_prefetch=0,
                grid=grid,
                in_specs=[
                    x_spec,
                    pl.BlockSpec((d_lane, d_lane), lambda i: (0, 0)),
                    gb_spec,
                    gb_spec,
                ],
                out_specs=out_spec,
            ),
            compiler_params=compiler_params,
            cost_estimate=cost,
        )(x2, avg, g2, b2)
    else:
        out = pl.pallas_call(
            functools.partial(_centernorm_kernel, scale=scale, cdtype=cdtype),
            out_shape=jax.ShapeDtypeStruct((prows, d_lane), x.dtype),
            grid_spec=pltpu.PrefetchScalarGridSpec(
                num_scalar_prefetch=0,
                grid=grid,
                in_specs=[x_spec, gb_spec, gb_spec],
                out_specs=out_spec,
            ),
            compiler_params=compiler_params,
            cost_estimate=cost,
        )(x2, g2, b2)

    return out.reshape(orig_shape)


def center_norm_ref(x, gamma, beta):
    """Pure-JAX reference matching the PyTorch forward exactly."""
    D = gamma.size
    mean = jnp.mean(x, axis=-1, keepdims=True)
    centered = x - mean
    scaled = centered * (D / (D - 1))
    return scaled * gamma + beta


if __name__ == "__main__":
    key = jax.random.PRNGKey(0)

    # 1) Demo shape consistent with the module: batch=2, seq=8, hidden=32.
    #    D=32 -> lane-packed path (k=4, lane width 128).
    hidden = 32
    x = jax.random.normal(key, (2, 8, hidden), dtype=jnp.float32)
    gamma = jnp.ones((hidden,), dtype=jnp.float32)   # module init: ones
    beta = jnp.zeros((hidden,), dtype=jnp.float32)   # module init: zeros

    out = jax.block_until_ready(center_norm(x, gamma, beta))
    ref = center_norm_ref(x, gamma, beta)
    assert out.shape == x.shape and out.dtype == x.dtype
    assert jnp.allclose(out, ref, atol=1e-5, rtol=1e-5), "mismatch vs reference"

    # 2) Ragged last block + lane-dense D=256, multiple grid steps (unpacked).
    x2 = jax.random.normal(jax.random.PRNGKey(1), (4, 37, 256), dtype=jnp.float32)
    g2 = jax.random.normal(jax.random.PRNGKey(2), (256,), dtype=jnp.float32)
    b2 = jax.random.normal(jax.random.PRNGKey(3), (256,), dtype=jnp.float32)
    out2 = jax.block_until_ready(center_norm(x2, g2, b2, block_rows=64))
    ref2 = center_norm_ref(x2, g2, b2)
    assert jnp.allclose(out2, ref2, atol=1e-5, rtol=1e-5), "ragged-block mismatch"

    # 3) Lane-packed path with non-trivial gamma/beta (checks the tiled layout).
    x3 = jax.random.normal(jax.random.PRNGKey(4), (4, 16, 64), dtype=jnp.float32)
    g3 = jax.random.normal(jax.random.PRNGKey(5), (64,), dtype=jnp.float32)
    b3 = jax.random.normal(jax.random.PRNGKey(6), (64,), dtype=jnp.float32)
    out3 = jax.block_until_ready(center_norm(x3, g3, b3))
    ref3 = center_norm_ref(x3, g3, b3)
    assert jnp.allclose(out3, ref3, atol=1e-5, rtol=1e-5), "packed-gamma mismatch"

    # 4) bf16 compute path (mean accumulated in f32, elementwise in bf16).
    x4 = jax.random.normal(jax.random.PRNGKey(7), (2, 8, 256)).astype(jnp.bfloat16)
    g4 = jnp.ones((256,), dtype=jnp.bfloat16)
    b4 = jnp.zeros((256,), dtype=jnp.bfloat16)
    out4 = jax.block_until_ready(center_norm(x4, g4, b4))
    ref4 = center_norm_ref(x4.astype(jnp.float32), g4.astype(jnp.float32),
                           b4.astype(jnp.float32))
    assert out4.dtype == jnp.bfloat16
    assert jnp.allclose(out4.astype(jnp.float32), ref4, atol=1e-1, rtol=1e-1), (
        "bf16 mismatch")

    print("KERNEL_OK")
</pallas_src>

<mosaic_0001>
module attributes {stable_mosaic.version = 11 : i64} {
  func.func @_centernorm_packed_kernel(%arg0: i32, %arg1: memref<8x128xf32, #tpu.memory_space<vmem>>, %arg2: memref<128x128xf32, #tpu.memory_space<vmem>>, %arg3: memref<1x128xf32, #tpu.memory_space<vmem>>, %arg4: memref<1x128xf32, #tpu.memory_space<vmem>>, %arg5: memref<8x128xf32, #tpu.memory_space<vmem>>) attributes {dimension_semantics = [#tpu.dimension_semantics<parallel>], iteration_bounds = array<i64: 1>, scalar_prefetch = 0 : i64, scratch_operands = 0 : i64, tpu.core_type = #tpu.core_type<tc>, window_params = [{transform_indices = @transform_0, window_bounds = array<i64: 8, 128>}, {pipeline_mode = #tpu.pipeline_mode<synchronous>, transform_indices = @transform_1, window_bounds = array<i64: 128, 128>}, {pipeline_mode = #tpu.pipeline_mode<synchronous>, transform_indices = @transform_2, window_bounds = array<i64: 1, 128>}, {pipeline_mode = #tpu.pipeline_mode<synchronous>, transform_indices = @transform_3, window_bounds = array<i64: 1, 128>}, {transform_indices = @transform_4, window_bounds = array<i64: 8, 128>}]} {
    %c0 = arith.constant 0 : index
    %c0_0 = arith.constant 0 : index
    %0 = vector.load %arg1[%c0, %c0_0] : memref<8x128xf32, #tpu.memory_space<vmem>>, vector<8x128xf32>
    %c0_1 = arith.constant 0 : index
    %c0_2 = arith.constant 0 : index
    %1 = vector.load %arg2[%c0_1, %c0_2] : memref<128x128xf32, #tpu.memory_space<vmem>>, vector<128x128xf32>
    %cst = arith.constant dense<0.000000e+00> : vector<8x128xf32>
    %2 = tpu.matmul %0, %1, %cst {dimension_numbers = #tpu.dot_dimension_numbers<[1], [0], [0], [1], [0, 0, 1, 1], [], []>} : vector<8x128xf32>, vector<128x128xf32>, vector<8x128xf32> -> vector<8x128xf32>
    %c0_3 = arith.constant 0 : index
    %c0_4 = arith.constant 0 : index
    %3 = vector.load %arg3[%c0_3, %c0_4] : memref<1x128xf32, #tpu.memory_space<vmem>>, vector<1x128xf32>
    %cst_5 = arith.constant 1.03225803 : f32
    %4 = vector.broadcast %cst_5 : f32 to vector<1x128xf32>
    %5 = arith.mulf %3, %4 : vector<1x128xf32>
    %c0_6 = arith.constant 0 : index
    %c0_7 = arith.constant 0 : index
    %6 = vector.load %arg4[%c0_6, %c0_7] : memref<1x128xf32, #tpu.memory_space<vmem>>, vector<1x128xf32>
    %7 = arith.subf %0, %2 : vector<8x128xf32>
    %8 = vector.broadcast %5 : vector<1x128xf32> to vector<8x128xf32>
    %9 = arith.mulf %7, %8 : vector<8x128xf32>
    %10 = vector.broadcast %6 : vector<1x128xf32> to vector<8x128xf32>
    %11 = arith.addf %9, %10 : vector<8x128xf32>
    %c0_8 = arith.constant 0 : index
    %c0_9 = arith.constant 0 : index
    %12 = vector.load %arg5[%c0_8, %c0_9] : memref<8x128xf32, #tpu.memory_space<vmem>>, vector<8x128xf32>
    tpu.vector_store %arg5[%c0_8, %c0_9], %11 {strides = array<i32>} : memref<8x128xf32, #tpu.memory_space<vmem>>, vector<8x128xf32>,
    return
  }
  func.func @transform_0(%arg0: i32) -> (i32, i32) {
    %c0_i32 = arith.constant 0 : i32
    %c0_i32_0 = arith.constant 0 : i32
    return %arg0, %c0_i32 : i32, i32
  }
  func.func @transform_1(%arg0: i32) -> (i32, i32) {
    %c0_i32 = arith.constant 0 : i32
    %c0_i32_0 = arith.constant 0 : i32
    %c0_i32_1 = arith.constant 0 : i32
    return %c0_i32, %c0_i32_0 : i32, i32
  }
  func.func @transform_2(%arg0: i32) -> (i32, i32) {
    %c0_i32 = arith.constant 0 : i32
    %c0_i32_0 = arith.constant 0 : i32
    %c0_i32_1 = arith.constant 0 : i32
    return %c0_i32, %c0_i32_0 : i32, i32
  }
  func.func @transform_3(%arg0: i32) -> (i32, i32) {
    %c0_i32 = arith.constant 0 : i32
    %c0_i32_0 = arith.constant 0 : i32
    %c0_i32_1 = arith.constant 0 : i32
    return %c0_i32, %c0_i32_0 : i32, i32
  }
  func.func @transform_4(%arg0: i32) -> (i32, i32) {
    %c0_i32 = arith.constant 0 : i32
    %c0_i32_0 = arith.constant 0 : i32
    return %arg0, %c0_i32 : i32, i32
  }
}

</mosaic_0001>

<bundles_post_ra>
// kernel: tpu_custom_call.1
= control target key start
LH: loop header
LB: loop body
LE: loop exit
PB: predicated region body
PF: predicated region fallthrough
CT: control target
= control target key end

     0   :  { %9 = vsyncpa [#allocation3], 0  ;;  %s412_s0 = inlined_call_operand.hbm [shape: f32[4,128], index: 0, kind: input, shape index: {}]   ;;  %s413_s1 = inlined_call_operand.hbm [shape: f32[128,128], index: 1, kind: input, shape index: {}]   ;;  %s414_s2 = inlined_call_operand.vmem [shape: f32[1,128], index: 2, kind: input, shape index: {}]   ;;  %s415_s3 = inlined_call_operand.vmem [shape: f32[1,128], index: 3, kind: input, shape index: {}]   ;;  %s416_s4 = inlined_call_operand.hbm [shape: f32[4,128], index: 4, kind: output, shape index: {}]  }
   0x1   :  { %10 = vsyncpa [#allocation6], 0 }
   0x2   :  { %11 = vsyncpa [#allocation4], 0 }
   0x3   :  { %16 = vsyncadd [#allocation3], 64  ;;  %s329_s15 = smov [#allocation2]   ;;  %s257_s19 = scalar_lea.hbm %s412_s0, 64 }
   0x4   :  { %s17_s16 = sshll.u32 %s329_s15, 4  ;;  %p258_p0 = scmp.ne.s32.totalorder %s412_s0, %s257_s19  ;;  %s18_s16 = int_to_ptr.vmem [resolvable:$true] %s17_s16 }
   0x5   :  { %p261_p1 = scmp.lt.u32.totalorder %s257_s19, %s412_s0 }
   0x7   :  { %p263_p2 = pnand %p261_p1, %p258_p0 }
   0x9   :  { %266 = shalt.err (!%p263_p2)
}
   0xa   :  { %s267_s24 = scalar_lea.vmem %s18_s16, 64  ;;  %s271_s25 = scalar_lea.vmem %s18_s16, 128 }
   0xb   :  { %p268_p3 = scmp.ne.s32.totalorder %s18_s16, %s267_s24  ;;  %p272_p4 = scmp.lt.s32.totalorder %s18_s16, %s18_s16 }
   0xc   :  { %p273_p5 = scmp.lt.s32.totalorder %s271_s25, %s267_s24 }
   0xe   :  { %p274_p6 = por %p273_p5, %p272_p4 }
  0x10   :  { %p275_p7 = pnand %p274_p6, %p268_p3 }
  0x12   :  { %278 = shalt.err (!%p275_p7)
}
  0x13   :  { %s330_s26 = smov 64   ;;  %s331_s27 = smov 4  }
  0x14   :  { %23 = dma.hbm_to_vmem [thread:$0]  %s412_s0, 64, %s18_s16, [#allocation3], %s330_s26, %s330_s26, %s331_s27  }
  0x15   :  { %s332_s30 = smov [#allocation5]   ;;  %s279_s8 = scalar_lea.hbm %s413_s1, 2048 }
  0x16   :  { %s29_s5 = sshll.u32 %s332_s30, 4  ;;  %p280_p8 = scmp.ne.s32.totalorder %s413_s1, %s279_s8  ;;  %s30_s5 = int_to_ptr.vmem [resolvable:$true] %s29_s5 }
  0x17   :  { %p283_p9 = scmp.lt.u32.totalorder %s279_s8, %s413_s1 }
  0x19   :  { %p285_p10 = pnand %p283_p9, %p280_p8 }
  0x1b   :  { %288 = shalt.err (!%p285_p10)
}
  0x1c   :  { %s289_s13 = scalar_lea.vmem %s30_s5, 2048  ;;  %p294_p12 = scmp.lt.s32.totalorder %s30_s5, %s30_s5 }
  0x1d   :  { %p290_p11 = scmp.ne.s32.totalorder %s30_s5, %s289_s13  ;;  %p295_p13 = scmp.lt.s32.totalorder %s289_s13, %s289_s13 }
  0x1f   :  { %p296_p0 = por %p295_p13, %p294_p12 }
  0x21   :  { %p297_p1 = pnand %p296_p0, %p290_p11 }
  0x23   :  { %300 = shalt.err (!%p297_p1)
}
  0x24   :  { %s333_s0 = smov 128   ;;  %s334_s14 = smov 8  }
  0x25   :  { %35 = dma.hbm_to_vmem [thread:$0]  %s413_s1, 2048, %s30_s5, [#allocation6], %s333_s0, %s333_s0, %s334_s14  }
  0x26   :  { %323 = dma.done.wait [#allocation3], 128  }
  0x27   :  { %324 = vsyncadd [#allocation3], 4294967168 }
  0x28   :  { %325 = dma.done.wait [#allocation6], 2048  }
  0x29   :  { %326 = vsyncadd [#allocation6], 4294965248  ;;  %v335_v0 = vmov 0.0|0.0   ;;  %vm336_vm0 = vmmov 0   ;;  %v337_v1 = vmov 0.0   ;;  %v47_v2 = vld [vmem:[#allocation5] sm:$0xff]  ;;  %v138_v27 = vlaneseq }
  0x2a   :  { %223 = vmatprep.subr.bf16.mxu0 %v335_v0  ;;  %220 = vmatprep.mubr.msk.f32.mxu0 %vm336_vm0, %v337_v1  ;;  %v48_v3 = vld [vmem:[#allocation5 + $0x8] sm:$0xff]  ;;  %v49_v4 = vld [vmem:[#allocation5 + $0x10] sm:$0xff]  ;;  %v50_v6 = vld [vmem:[#allocation5 + $0x18] sm:$0xff] }
  0x2b   :  { %v224_v5 = vpack.c.bf16 %v48_v3, %v47_v2  ;;  %v227_v7 = vpack.c.bf16 %v50_v6, %v49_v4  ;;  %v51_v8 = vld [vmem:[#allocation5 + $0x20] sm:$0xff]  ;;  %v52_v9 = vld [vmem:[#allocation5 + $0x28] sm:$0xff]  ;;  %v53_v11 = vld [vmem:[#allocation5 + $0x30] sm:$0xff]  ;;  %v139_v28 = vshrl.u32 %v138_v27, 7 }
  0x2c   :  { %v230_v10 = vpack.c.bf16 %v52_v9, %v51_v8  ;;  %v54_v12 = vld [vmem:[#allocation5 + $0x38] sm:$0xff]  ;;  %v55_v14 = vld [vmem:[#allocation5 + $0x40] sm:$0xff]  ;;  %v56_v15 = vld [vmem:[#allocation5 + $0x48] sm:$0xff] }
  0x2d   :  { %225 = vmatpush3.bf16.msra.mxu0 %v224_v5  ;;  %v233_v13 = vpack.c.bf16 %v54_v12, %v53_v11  ;;  %v236_v16 = vpack.c.bf16 %v56_v15, %v55_v14  ;;  %v57_v17 = vld [vmem:[#allocation5 + $0x50] sm:$0xff]  ;;  %v58_v18 = vld [vmem:[#allocation5 + $0x58] sm:$0xff]  ;;  %v59_v20 = vld [vmem:[#allocation5 + $0x60] sm:$0xff]  ;;  %v140_v31 = vsub.s32 0, %v139_v28 }
  0x2e   :  { %226 = vmatprep.subr.bf16.mxu0 %v335_v0  ;;  %v239_v19 = vpack.c.bf16 %v58_v18, %v57_v17  ;;  %v60_v21 = vld [vmem:[#allocation5 + $0x68] sm:$0xff]  ;;  %v61_v23 = vld [vmem:[#allocation5 + $0x70] sm:$0xff]  ;;  %v62_v24 = vld [vmem:[#allocation5 + $0x78] sm:$0xff] }
  0x2f   :  { %v242_v22 = vpack.c.bf16 %v60_v21, %v59_v20  ;;  %v245_v25 = vpack.c.bf16 %v62_v24, %v61_v23  ;;  %v46_v26 = vld [vmem:[#allocation2] sm:$0xff] }
  0x30   :  { %v133_v29 = vld [vmem:[%s414_s2] sm:$0x1] }
  0x31   :  { %228 = vmatpush3.bf16.msra.mxu0 %v227_v7  ;;  %v134_v30 = vmul.f32 1.032258, %v133_v29  ;;  %v170_v36 = vld [vmem:[%s415_s3] ss:$0 sm:$0xff] }
  0x32   :  { %229 = vmatprep.subr.bf16.mxu0 %v335_v0 }
  0x33   :  { %v141_v32 = vrot.slane %v134_v30, %v140_v31 }
  0x35   :  { %231 = vmatpush3.bf16.msra.mxu0 %v230_v10 }
  0x36   :  { %232 = vmatprep.subr.bf16.mxu0 %v335_v0 }
  0x39   :  { %234 = vmatpush3.bf16.msra.mxu0 %v233_v13 }
  0x3a   :  { %235 = vmatprep.subr.bf16.mxu0 %v335_v0 }
  0x3d   :  { %237 = vmatpush3.bf16.msra.mxu0 %v236_v16 }
  0x3e   :  { %238 = vmatprep.subr.bf16.mxu0 %v335_v0 }
  0x41   :  { %240 = vmatpush3.bf16.msra.mxu0 %v239_v19 }
  0x42   :  { %241 = vmatprep.subr.bf16.mxu0 %v335_v0 }
  0x45   :  { %243 = vmatpush3.bf16.msra.mxu0 %v242_v22 }
  0x46   :  { %244 = vmatprep.subr.bf16.mxu0 %v335_v0 }
  0x49   :  { %246 = vmatpush3.bf16.msra.mxu0 %v245_v25 }
  0x4c   :  { %221 = vmatmul.mubr.f32.vlgmr.msra.gmra.mrb[0].mxu0 %v46_v26 }
 0x11f   :  { %v129_v33 = vpop.f32.mrb[0].mxu0 }
 0x120   :  { %v136_v34 = vsub.f32 %v46_v26, %v129_v33  ;;  %v222_v35 = vpop.f32.mrb[1].mxu0 }
 0x122   :  { %v143_v37 = vmul.f32 %v141_v32, %v136_v34 }
 0x124   :  { %v150_v38 = vadd.f32 %v170_v36, %v143_v37 }
 0x126   :  { %151 = vst [vmem:[#allocation7] sm:$0xff] %v150_v38 }
 0x127   :  { %156 = vsyncadd [#allocation4], 64  ;;  %s338_s20 = smov [#allocation7]  }
 0x128   :  { %s157_s21 = sshll.u32 %s338_s20, 4  ;;  %s158_s21 = int_to_ptr.vmem [resolvable:$true] %s157_s21 }
 0x129   :  { %s301_s22 = scalar_lea.vmem %s158_s21, 64  ;;  %s305_s2 = scalar_lea.vmem %s158_s21, 128 }
 0x12a   :  { %p302_p2 = scmp.ne.s32.totalorder %s158_s21, %s301_s22  ;;  %p306_p3 = scmp.lt.s32.totalorder %s158_s21, %s158_s21 }
 0x12b   :  { %p307_p4 = scmp.lt.s32.totalorder %s305_s2, %s301_s22 }
 0x12d   :  { %p308_p5 = por %p307_p4, %p306_p3 }
 0x12f   :  { %p309_p6 = pnand %p308_p5, %p302_p2 }
 0x131   :  { %312 = shalt.err (!%p309_p6)
}
 0x132   :  { %s313_s25 = scalar_lea.hbm %s416_s4, 64 }
 0x133   :  { %p314_p7 = scmp.ne.s32.totalorder %s416_s4, %s313_s25  ;;  %p317_p8 = scmp.lt.u32.totalorder %s313_s25, %s416_s4 }
 0x135   :  { %p319_p9 = pnand %p317_p8, %p314_p7 }
 0x137   :  { %322 = shalt.err (!%p319_p9)
}
 0x138   :  { %163 = dma.vmem_to_hbm [thread:$0]  %s158_s21, 64, %s416_s4, [#allocation4], %s330_s26, %s330_s26, %s331_s27  }
 0x139   :  { %327 = dma.done.wait [#allocation4], 128  }
 0x13a   :  { %328 = vsyncadd [#allocation4], 4294967168 }
 0x13b   :  { %167 = vsyncpa [#allocation3], 1 }
 0x13c   :  { %168 = vsyncpa [#allocation6], 1 }
 0x13d   :  { %169 = vsyncpa [#allocation4], 1 }

</bundles_post_ra>
